<compile_context>
chip_gen: v5e
topology: v5e:2x2
jax: 0.10.0
libtpu: 0.0.40
codegen_flags: <defaults>
</compile_context>

<pallas_src>
import functools

import jax
import jax.numpy as jnp
from jax.experimental import pallas as pl
from jax.experimental.pallas import tpu as pltpu

_NUM_CLASSES = 7
_LANES = 128
# Tile quantum 4096 samples -> rows-per-tile multiple of 32, valid native tiling
# for f32 (8,128), bf16 (16,128) and int8 (32,128) blocks alike.
_TILE_QUANTUM = 4096


def _custom_loss2_kernel(logits_ref, targets_ref, out_ref):
    """Blocks: logits (7, R, 128), targets (1, R, 128) int8, out (8, 128) f32."""
    rows = logits_ref.shape[1]

    z_full = logits_ref[...].astype(jnp.float32)        # (7, R, 128); f32 math in-kernel
    t = targets_ref[...].astype(jnp.int32)[0]           # (R, 128); -1 marks padding

    # Numerically stable log-sum-exp over classes; class axis is the leading dim
    # so max/sum are VALU adds of 7 slabs (no XLU sublane reduces).
    m = jnp.max(z_full, axis=0)                          # (R, 128)
    z = z_full - m[None]                                 # (7, R, 128)
    e = jnp.exp(z)                                       # the only exp pass (7 / sample)
    s = jnp.sum(e, axis=0)                               # (R, 128)
    lse = jnp.log(s)

    # z[target] via 7 static class compares (no iota, no gather).
    z_at_t = jnp.zeros_like(s)
    for cls in range(_NUM_CLASSES):
        z_at_t = z_at_t + jnp.where(t == cls, z[cls], 0.0)

    # Grouped-class exp sums: static leading-index slices -> VALU adds.
    pos = e[0] + e[1]                    # classes 0..1
    neg = e[2] + e[3] + e[4] + e[5]      # classes 2..5
    neu = e[6]                           # class 6
    grp = jnp.where(t < 2, pos, jnp.where(t <= 5, neg, neu))
    # Guard f32 underflow of the group exp-sum (torch reference would give +inf).
    grp = jnp.maximum(grp, jnp.float32(1e-37))

    # loss1 + loss2 per sample = 2*lse - z[target] - log(group exp-sum).
    loss = 2.0 * lse - z_at_t - jnp.log(grp)             # (R, 128)
    # Mask padded samples via select BEFORE any reduction (no inf*0 -> NaN path).
    loss = jnp.where(t >= 0, loss, 0.0)

    # Lane/sublane-preserving partial: pure VALU adds of (8,128) chunks; no
    # cross-lane reduce or zeros+broadcast in the per-tile epilogue.
    partial = loss[0:8]
    for r0 in range(8, rows, 8):
        partial = partial + loss[r0:r0 + 8]
    out_ref[...] = partial


def _round_up(x, m):
    return (x + m - 1) // m * m


def _reference_loss(logits, targets):
    """Pure-JAX path mirroring the PyTorch module (also the small-N fast path)."""
    log_probs = jax.nn.log_softmax(logits, axis=1)
    loss1 = -jnp.mean(jnp.take_along_axis(log_probs, targets[:, None], axis=1))
    probs = jax.nn.softmax(logits, axis=1)
    pos = jnp.sum(probs[:, :2], axis=1)
    neg = jnp.sum(probs[:, 2:6], axis=1)
    neu = probs[:, 6]
    new_t = jnp.where(targets < 2, 0, jnp.where(targets <= 5, 1, 2))
    grouped = jnp.stack([pos, neg, neu], axis=1)
    loss2 = -jnp.mean(jnp.take_along_axis(jnp.log(grouped), new_t[:, None], axis=1))
    return loss1 + loss2


@functools.partial(
    jax.jit, static_argnames=("max_tile_n", "small_n_threshold", "force_pallas")
)
def custom_loss2(predicted_probabilities, targets, *, max_tile_n=131072,
                 small_n_threshold=32768, force_pallas=False):
    """predicted_probabilities: (N, 7) float logits; targets: (N,) int class ids in [0,7)."""
    n, c = predicted_probabilities.shape
    assert c == _NUM_CLASSES, "CustomLoss2 assumes 7 emotion classes"
    assert max_tile_n % _TILE_QUANTUM == 0

    # Small batches: staging + pallas_call launch + one-tile grid fixed cost exceed
    # the whole roofline time of this loss -> use the fused XLA path instead.
    if not force_pallas and n < small_n_threshold:
        return _reference_loss(predicted_probabilities, targets)

    # Tile the batch. Big tiles amortize the ~0.35 us per-grid-step cost, but keep
    # num_tiles >= 2 when the batch allows it so the "parallel" axis can feed both
    # v7x TensorCores; max_tile_n caps the double-buffered VMEM footprint
    # (131072 samples -> ~3.7 MiB f32 logits block, ~8 MiB double-buffered).
    if n >= 2 * _TILE_QUANTUM:
        tile_n = _round_up((n + 1) // 2, _TILE_QUANTUM)
    else:
        tile_n = _TILE_QUANTUM
    tile_n = min(tile_n, max_tile_n)
    n_pad = _round_up(n, tile_n)
    num_tiles = n_pad // tile_n
    rows = tile_n // _LANES

    # Lane-dense, class-major staging. Keep the input dtype (kernel upcasts to f32).
    # TODO(synk): have the upstream head emit class-major (7, N) logits so this
    # transpose+pad HBM round-trip disappears entirely.
    logits_t = jnp.transpose(predicted_probabilities)               # (7, N)
    logits_t = jnp.pad(logits_t, ((0, 0), (0, n_pad - n)))
    logits_3d = logits_t.reshape(c, n_pad // _LANES, _LANES)

    # int8 targets: 1 B/sample stream; padding marked with -1.
    t_flat = jnp.full((n_pad,), -1, dtype=jnp.int8)
    t_flat = t_flat.at[:n].set(targets.astype(jnp.int8))
    t_3d = t_flat.reshape(1, n_pad // _LANES, _LANES)

    partials = pl.pallas_call(
        _custom_loss2_kernel,
        out_shape=jax.ShapeDtypeStruct((num_tiles * 8, _LANES), jnp.float32),
        grid=(num_tiles,),
        in_specs=[
            pl.BlockSpec((c, rows, _LANES), lambda i: (0, i, 0)),
            pl.BlockSpec((1, rows, _LANES), lambda i: (0, i, 0)),
        ],
        out_specs=pl.BlockSpec((8, _LANES), lambda i: (i, 0)),
        compiler_params=pltpu.CompilerParams(
            dimension_semantics=("parallel",),        # independent per-tile partials
            vmem_limit_bytes=32 * 1024 * 1024,
        ),
    )(logits_3d, t_3d)

    # Finish the mean in the wrapper (padded samples contribute exactly 0).
    return jnp.sum(partials) / jnp.float32(n)


if __name__ == "__main__":
    key = jax.random.PRNGKey(0)
    k1, k2 = jax.random.split(key)
    N, C = 10000, 7  # 7 emotion classes as implied by the module's slicing
    logits = jax.random.normal(k1, (N, C), dtype=jnp.float32)
    targets = jax.random.randint(k2, (N,), 0, C, dtype=jnp.int32)

    # Force the Pallas path with a small tile so the demo exercises the tiled /
    # parallel / ragged-N code path (10000 samples -> 3 tiles of 4096, 2288 masked pads).
    loss = custom_loss2(logits, targets, max_tile_n=4096, force_pallas=True)
    jax.block_until_ready(loss)

    ref = _reference_loss(logits, targets)
    assert jnp.allclose(loss, ref, atol=3e-5, rtol=3e-5), (loss, ref)

    # Also exercise the auto-dispatch (small-N -> fused XLA) path once.
    loss_small = custom_loss2(logits[:200], targets[:200])
    jax.block_until_ready(loss_small)

    print("KERNEL_OK")
</pallas_src>

<mosaic_0001>
module attributes {stable_mosaic.version = 11 : i64} {
  func.func @_custom_loss2_kernel(%arg0: i32, %arg1: memref<7x32x128xf32, #tpu.memory_space<vmem>>, %arg2: memref<1x32x128xi8, #tpu.memory_space<vmem>>, %arg3: memref<8x128xf32, #tpu.memory_space<vmem>>) attributes {dimension_semantics = [#tpu.dimension_semantics<parallel>], iteration_bounds = array<i64: 3>, scalar_prefetch = 0 : i64, scratch_operands = 0 : i64, tpu.core_type = #tpu.core_type<tc>, window_params = [{transform_indices = @transform_0, window_bounds = array<i64: 7, 32, 128>}, {transform_indices = @transform_1, window_bounds = array<i64: 1, 32, 128>}, {transform_indices = @transform_2, window_bounds = array<i64: 8, 128>}]} {
    %c0 = arith.constant 0 : index
    %c0_0 = arith.constant 0 : index
    %c0_1 = arith.constant 0 : index
    %0 = vector.load %arg1[%c0, %c0_0, %c0_1] : memref<7x32x128xf32, #tpu.memory_space<vmem>>, vector<7x32x128xf32>
    %c0_2 = arith.constant 0 : index
    %c0_3 = arith.constant 0 : index
    %c0_4 = arith.constant 0 : index
    %1 = vector.load %arg2[%c0_2, %c0_3, %c0_4] : memref<1x32x128xi8, #tpu.memory_space<vmem>>, vector<1x32x128xi8>
    %2 = arith.extsi %1 : vector<1x32x128xi8> to vector<1x32x128xi32>
    %3 = vector.shape_cast %2 : vector<1x32x128xi32> to vector<32x128xi32>
    %cst = arith.constant dense<0xFF800000> : vector<32x128xf32>
    %4 = vector.multi_reduction <maximumf>, %0, %cst [0] : vector<7x32x128xf32> to vector<32x128xf32>
    %5 = vector.shape_cast %4 : vector<32x128xf32> to vector<1x32x128xf32>
    %6 = vector.broadcast %5 : vector<1x32x128xf32> to vector<7x32x128xf32>
    %7 = arith.subf %0, %6 : vector<7x32x128xf32>
    %8 = math.exp %7 : vector<7x32x128xf32>
    %cst_5 = arith.constant dense<0.000000e+00> : vector<32x128xf32>
    %9 = vector.multi_reduction <add>, %8, %cst_5 [0] : vector<7x32x128xf32> to vector<32x128xf32>
    %10 = math.log %9 : vector<32x128xf32>
    %cst_6 = arith.constant 0.000000e+00 : f32
    %11 = vector.broadcast %cst_6 : f32 to vector<32x128xf32>
    %c0_i32 = arith.constant 0 : i32
    %12 = vector.broadcast %c0_i32 : i32 to vector<32x128xi32>
    %13 = arith.cmpi eq, %3, %12 : vector<32x128xi32>
    %14 = vector.extract_strided_slice %7 {offsets = [0, 0, 0], sizes = [1, 32, 128], strides = [1, 1, 1]} : vector<7x32x128xf32> to vector<1x32x128xf32>
    %15 = vector.shape_cast %14 : vector<1x32x128xf32> to vector<32x128xf32>
    %cst_7 = arith.constant 0.000000e+00 : f32
    %16 = vector.broadcast %cst_7 : f32 to vector<32x128xf32>
    %17 = arith.select %13, %15, %16 : vector<32x128xi1>, vector<32x128xf32>
    %18 = arith.addf %11, %17 : vector<32x128xf32>
    %c1_i32 = arith.constant 1 : i32
    %19 = vector.broadcast %c1_i32 : i32 to vector<32x128xi32>
    %20 = arith.cmpi eq, %3, %19 : vector<32x128xi32>
    %21 = vector.extract_strided_slice %7 {offsets = [1, 0, 0], sizes = [1, 32, 128], strides = [1, 1, 1]} : vector<7x32x128xf32> to vector<1x32x128xf32>
    %22 = vector.shape_cast %21 : vector<1x32x128xf32> to vector<32x128xf32>
    %cst_8 = arith.constant 0.000000e+00 : f32
    %23 = vector.broadcast %cst_8 : f32 to vector<32x128xf32>
    %24 = arith.select %20, %22, %23 : vector<32x128xi1>, vector<32x128xf32>
    %25 = arith.addf %18, %24 : vector<32x128xf32>
    %c2_i32 = arith.constant 2 : i32
    %26 = vector.broadcast %c2_i32 : i32 to vector<32x128xi32>
    %27 = arith.cmpi eq, %3, %26 : vector<32x128xi32>
    %28 = vector.extract_strided_slice %7 {offsets = [2, 0, 0], sizes = [1, 32, 128], strides = [1, 1, 1]} : vector<7x32x128xf32> to vector<1x32x128xf32>
    %29 = vector.shape_cast %28 : vector<1x32x128xf32> to vector<32x128xf32>
    %cst_9 = arith.constant 0.000000e+00 : f32
    %30 = vector.broadcast %cst_9 : f32 to vector<32x128xf32>
    %31 = arith.select %27, %29, %30 : vector<32x128xi1>, vector<32x128xf32>
    %32 = arith.addf %25, %31 : vector<32x128xf32>
    %c3_i32 = arith.constant 3 : i32
    %33 = vector.broadcast %c3_i32 : i32 to vector<32x128xi32>
    %34 = arith.cmpi eq, %3, %33 : vector<32x128xi32>
    %35 = vector.extract_strided_slice %7 {offsets = [3, 0, 0], sizes = [1, 32, 128], strides = [1, 1, 1]} : vector<7x32x128xf32> to vector<1x32x128xf32>
    %36 = vector.shape_cast %35 : vector<1x32x128xf32> to vector<32x128xf32>
    %cst_10 = arith.constant 0.000000e+00 : f32
    %37 = vector.broadcast %cst_10 : f32 to vector<32x128xf32>
    %38 = arith.select %34, %36, %37 : vector<32x128xi1>, vector<32x128xf32>
    %39 = arith.addf %32, %38 : vector<32x128xf32>
    %c4_i32 = arith.constant 4 : i32
    %40 = vector.broadcast %c4_i32 : i32 to vector<32x128xi32>
    %41 = arith.cmpi eq, %3, %40 : vector<32x128xi32>
    %42 = vector.extract_strided_slice %7 {offsets = [4, 0, 0], sizes = [1, 32, 128], strides = [1, 1, 1]} : vector<7x32x128xf32> to vector<1x32x128xf32>
    %43 = vector.shape_cast %42 : vector<1x32x128xf32> to vector<32x128xf32>
    %cst_11 = arith.constant 0.000000e+00 : f32
    %44 = vector.broadcast %cst_11 : f32 to vector<32x128xf32>
    %45 = arith.select %41, %43, %44 : vector<32x128xi1>, vector<32x128xf32>
    %46 = arith.addf %39, %45 : vector<32x128xf32>
    %c5_i32 = arith.constant 5 : i32
    %47 = vector.broadcast %c5_i32 : i32 to vector<32x128xi32>
    %48 = arith.cmpi eq, %3, %47 : vector<32x128xi32>
    %49 = vector.extract_strided_slice %7 {offsets = [5, 0, 0], sizes = [1, 32, 128], strides = [1, 1, 1]} : vector<7x32x128xf32> to vector<1x32x128xf32>
    %50 = vector.shape_cast %49 : vector<1x32x128xf32> to vector<32x128xf32>
    %cst_12 = arith.constant 0.000000e+00 : f32
    %51 = vector.broadcast %cst_12 : f32 to vector<32x128xf32>
    %52 = arith.select %48, %50, %51 : vector<32x128xi1>, vector<32x128xf32>
    %53 = arith.addf %46, %52 : vector<32x128xf32>
    %c6_i32 = arith.constant 6 : i32
    %54 = vector.broadcast %c6_i32 : i32 to vector<32x128xi32>
    %55 = arith.cmpi eq, %3, %54 : vector<32x128xi32>
    %56 = vector.extract_strided_slice %7 {offsets = [6, 0, 0], sizes = [1, 32, 128], strides = [1, 1, 1]} : vector<7x32x128xf32> to vector<1x32x128xf32>
    %57 = vector.shape_cast %56 : vector<1x32x128xf32> to vector<32x128xf32>
    %cst_13 = arith.constant 0.000000e+00 : f32
    %58 = vector.broadcast %cst_13 : f32 to vector<32x128xf32>
    %59 = arith.select %55, %57, %58 : vector<32x128xi1>, vector<32x128xf32>
    %60 = arith.addf %53, %59 : vector<32x128xf32>
    %61 = vector.extract_strided_slice %8 {offsets = [0, 0, 0], sizes = [1, 32, 128], strides = [1, 1, 1]} : vector<7x32x128xf32> to vector<1x32x128xf32>
    %62 = vector.shape_cast %61 : vector<1x32x128xf32> to vector<32x128xf32>
    %63 = vector.extract_strided_slice %8 {offsets = [1, 0, 0], sizes = [1, 32, 128], strides = [1, 1, 1]} : vector<7x32x128xf32> to vector<1x32x128xf32>
    %64 = vector.shape_cast %63 : vector<1x32x128xf32> to vector<32x128xf32>
    %65 = arith.addf %62, %64 : vector<32x128xf32>
    %66 = vector.extract_strided_slice %8 {offsets = [2, 0, 0], sizes = [1, 32, 128], strides = [1, 1, 1]} : vector<7x32x128xf32> to vector<1x32x128xf32>
    %67 = vector.shape_cast %66 : vector<1x32x128xf32> to vector<32x128xf32>
    %68 = vector.extract_strided_slice %8 {offsets = [3, 0, 0], sizes = [1, 32, 128], strides = [1, 1, 1]} : vector<7x32x128xf32> to vector<1x32x128xf32>
    %69 = vector.shape_cast %68 : vector<1x32x128xf32> to vector<32x128xf32>
    %70 = arith.addf %67, %69 : vector<32x128xf32>
    %71 = vector.extract_strided_slice %8 {offsets = [4, 0, 0], sizes = [1, 32, 128], strides = [1, 1, 1]} : vector<7x32x128xf32> to vector<1x32x128xf32>
    %72 = vector.shape_cast %71 : vector<1x32x128xf32> to vector<32x128xf32>
    %73 = arith.addf %70, %72 : vector<32x128xf32>
    %74 = vector.extract_strided_slice %8 {offsets = [5, 0, 0], sizes = [1, 32, 128], strides = [1, 1, 1]} : vector<7x32x128xf32> to vector<1x32x128xf32>
    %75 = vector.shape_cast %74 : vector<1x32x128xf32> to vector<32x128xf32>
    %76 = arith.addf %73, %75 : vector<32x128xf32>
    %77 = vector.extract_strided_slice %8 {offsets = [6, 0, 0], sizes = [1, 32, 128], strides = [1, 1, 1]} : vector<7x32x128xf32> to vector<1x32x128xf32>
    %78 = vector.shape_cast %77 : vector<1x32x128xf32> to vector<32x128xf32>
    %c2_i32_14 = arith.constant 2 : i32
    %79 = vector.broadcast %c2_i32_14 : i32 to vector<32x128xi32>
    %80 = arith.cmpi slt, %3, %79 : vector<32x128xi32>
    %c5_i32_15 = arith.constant 5 : i32
    %81 = vector.broadcast %c5_i32_15 : i32 to vector<32x128xi32>
    %82 = arith.cmpi sle, %3, %81 : vector<32x128xi32>
    %83 = arith.select %82, %76, %78 : vector<32x128xi1>, vector<32x128xf32>
    %84 = arith.select %80, %65, %83 : vector<32x128xi1>, vector<32x128xf32>
    %cst_16 = arith.constant 9.99999991E-38 : f32
    %85 = vector.broadcast %cst_16 : f32 to vector<32x128xf32>
    %86 = arith.maximumf %84, %85 : vector<32x128xf32>
    %cst_17 = arith.constant 2.000000e+00 : f32
    %87 = vector.broadcast %cst_17 : f32 to vector<32x128xf32>
    %88 = arith.mulf %87, %10 : vector<32x128xf32>
    %89 = arith.subf %88, %60 : vector<32x128xf32>
    %90 = math.log %86 : vector<32x128xf32>
    %91 = arith.subf %89, %90 : vector<32x128xf32>
    %c0_i32_18 = arith.constant 0 : i32
    %92 = vector.broadcast %c0_i32_18 : i32 to vector<32x128xi32>
    %93 = arith.cmpi sge, %3, %92 : vector<32x128xi32>
    %cst_19 = arith.constant 0.000000e+00 : f32
    %94 = vector.broadcast %cst_19 : f32 to vector<32x128xf32>
    %95 = arith.select %93, %91, %94 : vector<32x128xi1>, vector<32x128xf32>
    %96 = vector.extract_strided_slice %95 {offsets = [0, 0], sizes = [8, 128], strides = [1, 1]} : vector<32x128xf32> to vector<8x128xf32>
    %97 = vector.extract_strided_slice %95 {offsets = [8, 0], sizes = [8, 128], strides = [1, 1]} : vector<32x128xf32> to vector<8x128xf32>
    %98 = arith.addf %96, %97 : vector<8x128xf32>
    %99 = vector.extract_strided_slice %95 {offsets = [16, 0], sizes = [8, 128], strides = [1, 1]} : vector<32x128xf32> to vector<8x128xf32>
    %100 = arith.addf %98, %99 : vector<8x128xf32>
    %101 = vector.extract_strided_slice %95 {offsets = [24, 0], sizes = [8, 128], strides = [1, 1]} : vector<32x128xf32> to vector<8x128xf32>
    %102 = arith.addf %100, %101 : vector<8x128xf32>
    %c0_20 = arith.constant 0 : index
    %c0_21 = arith.constant 0 : index
    %103 = vector.load %arg3[%c0_20, %c0_21] : memref<8x128xf32, #tpu.memory_space<vmem>>, vector<8x128xf32>
    tpu.vector_store %arg3[%c0_20, %c0_21], %102 {strides = array<i32>} : memref<8x128xf32, #tpu.memory_space<vmem>>, vector<8x128xf32>,
    return
  }
  func.func @transform_0(%arg0: i32) -> (i32, i32, i32) {
    %c0_i32 = arith.constant 0 : i32
    %c0_i32_0 = arith.constant 0 : i32
    %c0_i32_1 = arith.constant 0 : i32
    return %c0_i32, %arg0, %c0_i32_0 : i32, i32, i32
  }
  func.func @transform_1(%arg0: i32) -> (i32, i32, i32) {
    %c0_i32 = arith.constant 0 : i32
    %c0_i32_0 = arith.constant 0 : i32
    %c0_i32_1 = arith.constant 0 : i32
    return %c0_i32, %arg0, %c0_i32_0 : i32, i32, i32
  }
  func.func @transform_2(%arg0: i32) -> (i32, i32) {
    %c0_i32 = arith.constant 0 : i32
    %c0_i32_0 = arith.constant 0 : i32
    return %arg0, %c0_i32 : i32, i32
  }
}

</mosaic_0001>

<bundles_post_ra>
// kernel: custom_loss2.1
= control target key start
LH: loop header
LB: loop body
LE: loop exit
PB: predicated region body
PF: predicated region fallthrough
CT: control target
= control target key end

     0   :  { %s845_s9 = smov 0   ;;  %s847_s10 = smov 0   ;;  %s1283_s0 = inlined_call_operand.vmem [shape: f32[7,96,128], index: 0, kind: input, shape index: {}]   ;;  %s1284_s1 = inlined_call_operand.vmem [shape: s8[1,96,128], index: 1, kind: input, shape index: {}]   ;;  %s1285_s2 = inlined_call_operand.vmem [shape: f32[24,128], index: 2, kind: output, shape index: {}]  }
   0x1   :  { %s849_s11 = smov 0  }
   0x2 LB: > { %s696_s12 = sadd.s32 4294967295, %s828_s11   ;;  %s862_s13 = sadd.s32 1, %s828_s11   ;;  %s828_s11 = sphi %s849_s11, %s1288_s11   ;;  %s824_s10 = sphi %s847_s10, %s1287_s10   ;;  %s820_s9 = sphi %s845_s9, %s1286_s9  }
   0x3   : > { %s16_s14 = ssub.s32 %s828_s11, %s862_s13  ;;  %s19_s15 = sadd.s32 1, %s824_s10 }
   0x4   : > { %p17_p0 = scmp.eq.s32.totalorder %s16_s14, 0  ;;  %p26_p1 = scmp.ne.s32.totalorder %s824_s10, %s820_s9 }
   0x5   : > { %p27_p2 = scmp.eq.s32.totalorder %s828_s11, 0  ;;  %p699_p4 = scmp.ge.s32.totalorder %s828_s11, 3 }
   0x6   : > { %s871_s16 = scalar_select %p17_p0, %s824_s10, %s19_s15  }
   0x7   : > { %p28_p3 = por %p27_p2, %p26_p1  ;;  %104 = sbr.rel (%p699_p4) target bundleno = 44 (0x2c), region = 16 }
   0xc   : > { %107 = sbr.rel (!%p28_p3) target bundleno = 44 (0x2c), region = 20  ;;  %s109_s17 = sand.u32 (%p28_p3), 1, %s824_s10  }
   0xd   : > { %s707_s18 = sshll.u32 (%p28_p3), %s828_s11, 5  ;;  %s708_s19 = smul.u32 (%p28_p3), 224, %s109_s17 }
   0xe   : > { %s879_s22 = scalar_lea.vmem (%p28_p3), %s1283_s0, %s707_s18 }
   0xf   : > { %v197_v0 = vld [vmem:[%s879_s22] sm:$0xff] (%p28_p3)  ;;  %v199_v1 = vld [vmem:[%s879_s22 + $0x8] sm:$0xff] (%p28_p3)  ;;  %v201_v2 = vld [vmem:[%s879_s22 + $0x10] sm:$0xff] (%p28_p3)  ;;  %s884_s23 = scalar_lea.vmem (%p28_p3), [#allocation2], %s708_s19 }
  0x10   : > { %198 = vst [vmem:[%s884_s23] sm:$0xff] (%p28_p3), %v197_v0  ;;  %v203_v3 = vld [vmem:[%s879_s22 + $0x18] sm:$0xff] (%p28_p3)  ;;  %v205_v4 = vld [vmem:[%s879_s22 + $0x60] sm:$0xff] (%p28_p3)  ;;  %v207_v5 = vld [vmem:[%s879_s22 + $0x68] sm:$0xff] (%p28_p3) }
  0x11   : > { %200 = vst [vmem:[%s884_s23 + $0x8] sm:$0xff] %v199_v1  ;;  %v209_v6 = vld [vmem:[%s879_s22 + $0x70] sm:$0xff]  ;;  %v211_v7 = vld [vmem:[%s879_s22 + $0x78] sm:$0xff]  ;;  %v213_v8 = vld [vmem:[%s879_s22 + $0xc0] sm:$0xff] }
  0x12   : > { %202 = vst [vmem:[%s884_s23 + $0x10] sm:$0xff] %v201_v2  ;;  %v215_v9 = vld [vmem:[%s879_s22 + $0xc8] sm:$0xff]  ;;  %v217_v10 = vld [vmem:[%s879_s22 + $0xd0] sm:$0xff]  ;;  %v219_v11 = vld [vmem:[%s879_s22 + $0xd8] sm:$0xff] }
  0x13   : > { %204 = vst [vmem:[%s884_s23 + $0x18] sm:$0xff] %v203_v3  ;;  %v221_v12 = vld [vmem:[%s879_s22 + $0x120] sm:$0xff]  ;;  %v223_v13 = vld [vmem:[%s879_s22 + $0x128] sm:$0xff]  ;;  %v225_v14 = vld [vmem:[%s879_s22 + $0x130] sm:$0xff] }
  0x14   : > { %206 = vst [vmem:[%s884_s23 + $0x20] sm:$0xff] %v205_v4  ;;  %v227_v15 = vld [vmem:[%s879_s22 + $0x138] sm:$0xff]  ;;  %v229_v16 = vld [vmem:[%s879_s22 + $0x180] sm:$0xff]  ;;  %v231_v17 = vld [vmem:[%s879_s22 + $0x188] sm:$0xff] }
  0x15   : > { %208 = vst [vmem:[%s884_s23 + $0x28] sm:$0xff] %v207_v5  ;;  %v233_v18 = vld [vmem:[%s879_s22 + $0x190] sm:$0xff]  ;;  %v235_v19 = vld [vmem:[%s879_s22 + $0x198] sm:$0xff]  ;;  %v237_v20 = vld [vmem:[%s879_s22 + $0x1e0] sm:$0xff] }
  0x16   : > { %210 = vst [vmem:[%s884_s23 + $0x30] sm:$0xff] %v209_v6  ;;  %v239_v21 = vld [vmem:[%s879_s22 + $0x1e8] sm:$0xff]  ;;  %v241_v22 = vld [vmem:[%s879_s22 + $0x1f0] sm:$0xff]  ;;  %v243_v23 = vld [vmem:[%s879_s22 + $0x1f8] sm:$0xff] }
  0x17   : > { %212 = vst [vmem:[%s884_s23 + $0x38] sm:$0xff] %v211_v7  ;;  %v245_v24 = vld [vmem:[%s879_s22 + $0x240] sm:$0xff]  ;;  %v247_v25 = vld [vmem:[%s879_s22 + $0x248] sm:$0xff]  ;;  %v249_v26 = vld [vmem:[%s879_s22 + $0x250] sm:$0xff] }
  0x18   : > { %214 = vst [vmem:[%s884_s23 + $0x40] sm:$0xff] %v213_v8  ;;  %v251_v27 = vld [vmem:[%s879_s22 + $0x258] sm:$0xff] }
  0x19   : > { %216 = vst [vmem:[%s884_s23 + $0x48] sm:$0xff] %v215_v9 }
  0x1a   : > { %218 = vst [vmem:[%s884_s23 + $0x50] sm:$0xff] %v217_v10 }
  0x1b   : > { %220 = vst [vmem:[%s884_s23 + $0x58] sm:$0xff] %v219_v11 }
  0x1c   : > { %222 = vst [vmem:[%s884_s23 + $0x60] sm:$0xff] %v221_v12 }
  0x1d   : > { %224 = vst [vmem:[%s884_s23 + $0x68] sm:$0xff] %v223_v13 }
  0x1e   : > { %226 = vst [vmem:[%s884_s23 + $0x70] sm:$0xff] %v225_v14 }
  0x1f   : > { %228 = vst [vmem:[%s884_s23 + $0x78] sm:$0xff] %v227_v15 }
  0x20   : > { %230 = vst [vmem:[%s884_s23 + $0x80] sm:$0xff] %v229_v16 }
  0x21   : > { %232 = vst [vmem:[%s884_s23 + $0x88] sm:$0xff] %v231_v17 }
  0x22   : > { %234 = vst [vmem:[%s884_s23 + $0x90] sm:$0xff] %v233_v18 }
  0x23   : > { %236 = vst [vmem:[%s884_s23 + $0x98] sm:$0xff] %v235_v19 }
  0x24   : > { %238 = vst [vmem:[%s884_s23 + $0xa0] sm:$0xff] %v237_v20 }
  0x25   : > { %240 = vst [vmem:[%s884_s23 + $0xa8] sm:$0xff] %v239_v21 }
  0x26   : > { %242 = vst [vmem:[%s884_s23 + $0xb0] sm:$0xff] %v241_v22 }
  0x27   : > { %244 = vst [vmem:[%s884_s23 + $0xb8] sm:$0xff] %v243_v23 }
  0x28   : > { %246 = vst [vmem:[%s884_s23 + $0xc0] sm:$0xff] %v245_v24 }
  0x29   : > { %248 = vst [vmem:[%s884_s23 + $0xc8] sm:$0xff] %v247_v25 }
  0x2a   : > { %250 = vst [vmem:[%s884_s23 + $0xd0] sm:$0xff] %v249_v26 }
  0x2b   : > { %252 = vst [vmem:[%s884_s23 + $0xd8] sm:$0xff] %v251_v27 }
  0x2c PF: > { %p702_p5 = scmp.ge.s32.totalorder %s828_s11, 1  ;;  %p264_p6 = scmp.lt.s32.totalorder %s828_s11, 4 }
  0x2e   : > { %p265_p7 = pnand %p702_p5, %p264_p6 }
  0x2f   : > { %s271_s24 = sand.u32 (!%p265_p7), 1, %s820_s9   ;;  %p296_p8 = scmp.lt.s32.totalorder (!%p265_p7), %s696_s12, 2 }
  0x30   : > { %268 = sbr.rel (%p265_p7) target bundleno = 141 (0x8d), region = 62 }
  0x31   : > { %s709_s25 = smul.u32 (!%p265_p7), 224, %s271_s24 }
  0x33   : > { %s944_s26 = scalar_lea.vmem (!%p265_p7), [#allocation2], %s709_s25 }
  0x35   : > { %v304_v28 = vld [vmem:[%s944_s26] sm:$0xff]  ;;  %v305_v29 = vld [vmem:[%s944_s26 + $0x8] sm:$0xff]  ;;  %v306_v30 = vld [vmem:[%s944_s26 + $0x10] sm:$0xff]  ;;  %s1290_s12 = smov (!%p296_p8, %s696_s12), 2 }
  0x36   : > { %v307_v31 = vld [vmem:[%s944_s26 + $0x18] sm:$0xff]  ;;  %v308_v32 = vld [vmem:[%s944_s26 + $0x20] sm:$0xff]  ;;  %v309_v33 = vld [vmem:[%s944_s26 + $0x28] sm:$0xff]  ;;  %s703_s27 = sshll.u32 %s1290_s12, 3 }
  0x37   : > { %v310_v34 = vld [vmem:[%s944_s26 + $0x30] sm:$0xff]  ;;  %v311_v35 = vld [vmem:[%s944_s26 + $0x38] sm:$0xff]  ;;  %v312_v36 = vld [vmem:[%s944_s26 + $0x40] sm:$0xff]  ;;  %v337_v37 = vmax.f32 %v304_v28, %v308_v32  ;;  %v343_v38 = vmax.f32 %v305_v29, %v309_v33  ;;  %s299_s30 = scalar_lea.vmem %s1284_s1, %s703_s27  ;;  %s303_s5 = scalar_lea.vmem %s1285_s2, %s703_s27 }
  0x38   : > { %v313_v39 = vld [vmem:[%s944_s26 + $0x48] sm:$0xff]  ;;  %v314_v40 = vld [vmem:[%s944_s26 + $0x50] sm:$0xff]  ;;  %v315_v41 = vld [vmem:[%s944_s26 + $0x58] sm:$0xff]  ;;  %v349_v42 = vmax.f32 %v306_v30, %v310_v34  ;;  %v355_v43 = vmax.f32 %v307_v31, %v311_v35 }
  0x39   : > { %v316_v44 = vld [vmem:[%s944_s26 + $0x60] sm:$0xff]  ;;  %v317_v45 = vld [vmem:[%s944_s26 + $0x68] sm:$0xff]  ;;  %v318_v46 = vld [vmem:[%s944_s26 + $0x70] sm:$0xff]  ;;  %v338_v47 = vmax.f32 %v337_v37, %v312_v36  ;;  %v344_v48 = vmax.f32 %v343_v38, %v313_v39 }
  0x3a   : > { %v319_v49 = vld [vmem:[%s944_s26 + $0x78] sm:$0xff]  ;;  %v320_v50 = vld [vmem:[%s944_s26 + $0x80] sm:$0xff]  ;;  %v321_v51 = vld [vmem:[%s944_s26 + $0x88] sm:$0xff]  ;;  %v350_v52 = vmax.f32 %v349_v42, %v314_v40  ;;  %v356_v53 = vmax.f32 %v355_v43, %v315_v41 }
  0x3b   : > { %v322_v54 = vld [vmem:[%s944_s26 + $0x90] sm:$0xff]  ;;  %v323_v55 = vld [vmem:[%s944_s26 + $0x98] sm:$0xff]  ;;  %v339_v56 = vmax.f32 %v338_v47, %v316_v44  ;;  %v345_v57 = vmax.f32 %v344_v48, %v317_v45  ;;  %v324_v58 = vld [vmem:[%s944_s26 + $0xa0] sm:$0xff] }
  0x3c   : > { %v351_v59 = vmax.f32 %v350_v52, %v318_v46  ;;  %v357_v60 = vmax.f32 %v356_v53, %v319_v49  ;;  %v325_v61 = vld [vmem:[%s944_s26 + $0xa8] sm:$0xff]  ;;  %v326_v62 = vld [vmem:[%s944_s26 + $0xb0] sm:$0xff]  ;;  %v327_v63 = vld [vmem:[%s944_s26 + $0xb8] sm:$0xff] }
  0x3d   : > { %v340_v0 = vmax.f32 %v339_v56, %v320_v50  ;;  %v346_v1 = vmax.f32 %v345_v57, %v321_v51  ;;  %v328_v2 = vld [vmem:[%s944_s26 + $0xc0] sm:$0xff]  ;;  %v329_v5 = vld [vmem:[%s944_s26 + $0xc8] sm:$0xff]  ;;  %v330_v6 = vld [vmem:[%s944_s26 + $0xd0] sm:$0xff] }
  0x3e   : > { %v352_v3 = vmax.f32 %v351_v59, %v322_v54  ;;  %v358_v4 = vmax.f32 %v357_v60, %v323_v55  ;;  %v331_v7 = vld [vmem:[%s944_s26 + $0xd8] sm:$0xff]  ;;  %v332_v12 = vld [vmem:[%s299_s30] sm:$0xff] }
  0x3f   : > { %v341_v8 = vmax.f32 %v340_v0, %v324_v58  ;;  %v347_v9 = vmax.f32 %v346_v1, %v325_v61  ;;  %v984_v17 = vunpack.c.0.s8 %v332_v12  ;;  %v986_v18 = vunpack.c.1.s8 %v332_v12 }
  0x40   : > { %v353_v10 = vmax.f32 %v352_v3, %v326_v62  ;;  %v359_v11 = vmax.f32 %v358_v4, %v327_v63  ;;  %v988_v19 = vunpack.c.2.s8 %v332_v12  ;;  %v990_v20 = vunpack.c.3.s8 %v332_v12 }
  0x41   : > { %v342_v13 = vmax.f32 %v341_v8, %v328_v2  ;;  %v348_v14 = vmax.f32 %v347_v9, %v329_v5  ;;  %vm477_vm0 = vcmp.eq.s32.totalorder %v984_v17, 0  ;;  %vm478_vm1 = vcmp.eq.s32.totalorder %v986_v18, 0 }
  0x42   : > { %v354_v15 = vmax.f32 %v353_v10, %v330_v6  ;;  %v360_v16 = vmax.f32 %v359_v11, %v331_v7  ;;  %vm479_vm2 = vcmp.eq.s32.totalorder %v988_v19, 0  ;;  %vm480_vm3 = vcmp.eq.s32.totalorder %v990_v20, 0 }
  0x43   : > { %v992_v21 = vsub.f32 %v304_v28, %v342_v13  ;;  %v994_v22 = vsub.f32 %v305_v29, %v348_v14  ;;  %v1000_v25 = vsub.f32 %v308_v32, %v342_v13  ;;  %v1002_v26 = vsub.f32 %v309_v33, %v348_v14 }
  0x44   : > { %v996_v23 = vsub.f32 %v306_v30, %v354_v15  ;;  %v998_v24 = vsub.f32 %v307_v31, %v360_v16  ;;  %v1004_v27 = vsub.f32 %v310_v34, %v354_v15  ;;  %v1006_v37 = vsub.f32 %v311_v35, %v360_v16 }
  0x45   : > { %v1008_v38 = vsub.f32 %v312_v36, %v342_v13  ;;  %v1010_v42 = vsub.f32 %v313_v39, %v348_v14  ;;  %v1012_v28 = vsub.f32 %v314_v40, %v354_v15  ;;  %v1014_v29 = vsub.f32 %v315_v41, %v360_v16 }
  0x46   : > { %v1016_v30 = vsub.f32 %v316_v44, %v342_v13  ;;  %v1018_v31 = vsub.f32 %v317_v45, %v348_v14  ;;  %v1020_v32 = vsub.f32 %v318_v46, %v354_v15  ;;  %v1022_v33 = vsub.f32 %v319_v49, %v360_v16 }
  0x47   : > { %v1024_v34 = vsub.f32 %v320_v50, %v342_v13  ;;  %v1026_v35 = vsub.f32 %v321_v51, %v348_v14  ;;  %v1028_v36 = vsub.f32 %v322_v54, %v354_v15  ;;  %v1030_v39 = vsub.f32 %v323_v55, %v360_v16 }
  0x48   : > { %v1032_v40 = vsub.f32 %v324_v58, %v342_v13  ;;  %v389_v41 = vmul.f32 1.442695, %v992_v21  ;;  %v391_v43 = vmul.f32 1.442695, %v994_v22  ;;  %v393_v44 = vmul.f32 1.442695, %v996_v23 }
  0x49   : > { %v1037_v45 = vsub.f32 %v325_v61, %v348_v14  ;;  %v1039_v46 = vsub.f32 %v326_v62, %v354_v15  ;;  %v1041_v47 = vsub.f32 %v327_v63, %v360_v16  ;;  %v395_v48 = vmul.f32 1.442695, %v998_v24 }
  0x4a   : > { %v1044_v49 = vsub.f32 %v328_v2, %v342_v13  ;;  %v1046_v50 = vsub.f32 %v329_v5, %v348_v14  ;;  %734 = vpow2.f32 %v389_v41  ;;  %v397_v51 = vmul.f32 1.442695, %v1000_v25 }
  0x4b   : > { %v1049_v52 = vsub.f32 %v330_v6, %v354_v15  ;;  %v1051_v53 = vsub.f32 %v331_v7, %v360_v16  ;;  %736 = vpow2.f32 %v391_v43  ;;  %v399_v54 = vmul.f32 1.442695, %v1002_v26 }
  0x4c   : > { %738 = vpow2.f32 %v393_v44  ;;  %v401_v55 = vmul.f32 1.442695, %v1004_v27  ;;  %v403_v56 = vmul.f32 1.442695, %v1006_v37  ;;  %v405_v57 = vmul.f32 1.442695, %v1008_v38 }
  0x4d   : > { %740 = vpow2.f32 %v395_v48  ;;  %v407_v58 = vmul.f32 1.442695, %v1010_v42  ;;  %v409_v59 = vmul.f32 1.442695, %v1012_v28  ;;  %v411_v60 = vmul.f32 1.442695, %v1014_v29 }
  0x4e   : > { %742 = vpow2.f32 %v397_v51  ;;  %v413_v61 = vmul.f32 1.442695, %v1016_v30  ;;  %v415_v62 = vmul.f32 1.442695, %v1018_v31  ;;  %v417_v63 = vmul.f32 1.442695, %v1020_v32 }
  0x4f   : > { %744 = vpow2.f32 %v399_v54  ;;  %v419_v0 = vmul.f32 1.442695, %v1022_v33  ;;  %v421_v1 = vmul.f32 1.442695, %v1024_v34  ;;  %v423_v2 = vmul.f32 1.442695, %v1026_v35 }
  0x50   : > { %v735_v3 = vpop.eup %734  ;;  %746 = vpow2.f32 %v401_v55  ;;  %v425_v4 = vmul.f32 1.442695, %v1028_v36  ;;  %v427_v5 = vmul.f32 1.442695, %v1030_v39  ;;  %v1069_v6 = vmul.f32 1.442695, %v1032_v40 }
  0x51   : > { %v737_v7 = vpop.eup %736  ;;  %748 = vpow2.f32 %v403_v56  ;;  %v1072_v8 = vmul.f32 1.442695, %v1037_v45  ;;  %v1075_v9 = vmul.f32 1.442695, %v1039_v46  ;;  %v1079_v11 = vmul.f32 1.442695, %v1041_v47 }
  0x52   : > { %v739_v10 = vpop.eup %738  ;;  %750 = vpow2.f32 %v405_v57  ;;  %v1082_v12 = vmul.f32 1.442695, %v1044_v49  ;;  %v1086_v14 = vmul.f32 1.442695, %v1046_v50  ;;  %v1089_v15 = vmul.f32 1.442695, %v1049_v52 }
  0x53   : > { %v741_v13 = vpop.eup %740  ;;  %752 = vpow2.f32 %v407_v58  ;;  %v1092_v16 = vmul.f32 1.442695, %v1051_v53  ;;  %v481_v43 = vsel %vm477_vm0, %v992_v21, 0.0  ;;  %v482_v51 = vsel %vm478_vm1, %v994_v22, 0.0 }
  0x54   : > { %v743_v41 = vpop.eup %742  ;;  %754 = vpow2.f32 %v409_v59  ;;  %vm489_vm4 = vcmp.eq.s32.totalorder %v984_v17, 1  ;;  %vm490_vm5 = vcmp.eq.s32.totalorder %v986_v18, 1  ;;  %vm491_vm6 = vcmp.eq.s32.totalorder %v988_v19, 1 }
  0x55   : > { %v745_v44 = vpop.eup %744  ;;  %756 = vpow2.f32 %v411_v60  ;;  %v1097_v48 = vadd.f32 %v743_v41, %v735_v3  ;;  %v483_v21 = vsel %vm479_vm2, %v996_v23, 0.0  ;;  %vm492_vm7 = vcmp.eq.s32.totalorder %v990_v20, 1 }
  0x56   : > { %v747_v54 = vpop.eup %746  ;;  %758 = vpow2.f32 %v413_v61  ;;  %v1101_v55 = vadd.f32 %v745_v44, %v737_v7  ;;  %v484_v59 = vsel %vm480_vm3, %v998_v24, 0.0  ;;  %v493_v60 = vsel %vm489_vm4, %v1000_v25, 0.0 }
  0x57   : > { %v749_v56 = vpop.eup %748  ;;  %760 = vpow2.f32 %v415_v62  ;;  %v1105_v57 = vadd.f32 %v747_v54, %v739_v10  ;;  %v494_v23 = vsel %vm490_vm5, %v1002_v26, 0.0  ;;  %v495_v3 = vsel %vm491_vm6, %v1004_v27, 0.0 }
  0x58   : > { %v1111_v22 = vpop.eup %750  ;;  %762 = vpow2.f32 %v417_v63  ;;  %v1113_v58 = vadd.f32 %v749_v56, %v741_v13  ;;  %v496_v24 = vsel %vm492_vm7, %v1006_v37, 0.0  ;;  %vm501_vm8 = vcmp.eq.s32.totalorder %v984_v17, 2 }
  0x59   : > { %v1119_v61 = vpop.eup %752  ;;  %764 = vpow2.f32 %v419_v0  ;;  %v446_v62 = vadd.f32 %v1111_v22, %v1097_v48  ;;  %v497_v10 = vadd.f32 %v493_v60, %v481_v43  ;;  %vm502_vm9 = vcmp.eq.s32.totalorder %v986_v18, 2 }
  0x5a   : > { %v1125_v7 = vpop.eup %754  ;;  %766 = vpow2.f32 %v421_v1  ;;  %v452_v63 = vadd.f32 %v1119_v61, %v1101_v55  ;;  %v498_v1 = vadd.f32 %v494_v23, %v482_v51  ;;  %vm503_vm10 = vcmp.eq.s32.totalorder %v988_v19, 2 }
  0x5b   : > { %v1131_v25 = vpop.eup %756  ;;  %768 = vpow2.f32 %v423_v2  ;;  %v458_v0 = vadd.f32 %v1125_v7, %v1105_v57  ;;  %vm504_vm11 = vcmp.eq.s32.totalorder %v990_v20, 2  ;;  %v505_v13 = vsel %vm501_vm8, %v1008_v38, 0.0 }
  0x5c   : > { %v1136_v26 = vpop.eup %758  ;;  %770 = vpow2.f32 %v425_v4  ;;  %v464_v27 = vadd.f32 %v1131_v25, %v1113_v58  ;;  %v499_v43 = vadd.f32 %v495_v3, %v483_v21  ;;  %v506_v44 = vsel %vm502_vm9, %v1010_v42, 0.0 }
  0x5d   : > { %v1141_v37 = vpop.eup %760  ;;  %772 = vpow2.f32 %v427_v5  ;;  %v447_v2 = vadd.f32 %v1136_v26, %v446_v62  ;;  %v500_v54 = vadd.f32 %v496_v24, %v484_v59  ;;  %v507_v56 = vsel %vm503_vm10, %v1012_v28, 0.0 }
  0x5e   : > { %v1146_v41 = vpop.eup %762  ;;  %774 = vpow2.f32 %v1069_v6  ;;  %v453_v4 = vadd.f32 %v1141_v37, %v452_v63  ;;  %v508_v6 = vsel %vm504_vm11, %v1014_v29, 0.0  ;;  %v509_v21 = vadd.f32 %v505_v13, %v497_v10 }
  0x5f   : > { %v1151_v51 = vpop.eup %764  ;;  %776 = vpow2.f32 %v1072_v8  ;;  %v459_v5 = vadd.f32 %v1146_v41, %v458_v0  ;;  %v510_v8 = vadd.f32 %v506_v44, %v498_v1  ;;  %vm513_vm12 = vcmp.eq.s32.totalorder %v984_v17, 3 }
  0x60   : > { %v1156_v60 = vpop.eup %766  ;;  %778 = vpow2.f32 %v1075_v9  ;;  %v465_v38 = vadd.f32 %v1151_v51, %v464_v27  ;;  %v511_v9 = vadd.f32 %v507_v56, %v499_v43  ;;  %vm514_vm13 = vcmp.eq.s32.totalorder %v986_v18, 3 }
  0x61   : > { %v1161_v62 = vpop.eup %768  ;;  %780 = vpow2.f32 %v1079_v11  ;;  %v448_v42 = vadd.f32 %v1156_v60, %v447_v2  ;;  %vm515_vm14 = vcmp.eq.s32.totalorder %v988_v19, 3  ;;  %vm516_vm15 = vcmp.eq.s32.totalorder %v990_v20, 3 }
  0x62   : > { %v1166_v59 = vpop.eup %770  ;;  %782 = vpow2.f32 %v1082_v12  ;;  %v454_v28 = vadd.f32 %v1161_v62, %v453_v4  ;;  %v512_v3 = vadd.f32 %v508_v6, %v500_v54  ;;  %v517_v63 = vsel %vm513_vm12, %v1016_v30, 0.0 }
  0x63   : > { %v1171_v29 = vpop.eup %772  ;;  %784 = vpow2.f32 %v1086_v14  ;;  %v460_v11 = vadd.f32 %v1166_v59, %v459_v5  ;;  %v518_v0 = vsel %vm514_vm13, %v1018_v31, 0.0  ;;  %vm525_vm0 = vcmp.eq.s32.totalorder %v984_v17, 4 }
  0x64   : > { %v1177_v23 = vpop.eup %774  ;;  %786 = vpow2.f32 %v1089_v15  ;;  %v466_v12 = vadd.f32 %v1171_v29, %v465_v38  ;;  %v519_v15 = vsel %vm515_vm14, %v1020_v32, 0.0  ;;  %v520_v1 = vsel %vm516_vm15, %v1022_v33, 0.0 }
  0x65   : > { %v1182_v24 = vpop.eup %776  ;;  %788 = vpow2.f32 %v1092_v16  ;;  %v449_v14 = vadd.f32 %v1177_v23, %v448_v42  ;;  %vm526_vm1 = vcmp.eq.s32.totalorder %v986_v18, 4  ;;  %v521_v2 = vadd.f32 %v517_v63, %v509_v21 }
  0x66   : > { %v1188_v10 = vpop.eup %778  ;;  %v455_v27 = vadd.f32 %v1182_v24, %v454_v28  ;;  %vm527_vm2 = vcmp.eq.s32.totalorder %v988_v19, 4  ;;  %v522_v4 = vadd.f32 %v518_v0, %v510_v8  ;;  %vm528_vm3 = vcmp.eq.s32.totalorder %v990_v20, 4 }
  0x67   : > { %v1194_v30 = vpop.eup %780  ;;  %v461_v16 = vadd.f32 %v1188_v10, %v460_v11  ;;  %v529_v32 = vsel %vm525_vm0, %v1024_v34, 0.0  ;;  %v523_v44 = vadd.f32 %v519_v15, %v511_v9  ;;  %v524_v5 = vadd.f32 %v520_v1, %v512_v3 }
  0x68   : > { %v1198_v31 = vpop.eup %782  ;;  %v467_v13 = vadd.f32 %v1194_v30, %v466_v12  ;;  %v530_v54 = vsel %vm526_vm1, %v1026_v35, 0.0  ;;  %v531_v6 = vsel %vm527_vm2, %v1028_v36, 0.0  ;;  %vm537_vm4 = vcmp.eq.s32.totalorder %v984_v17, 5 }
  0x69   : > { %v1203_v43 = vpop.eup %784  ;;  %v450_v33 = vadd.f32 %v1198_v31, %v449_v14  ;;  %vm538_vm5 = vcmp.eq.s32.totalorder %v986_v18, 5  ;;  %v532_v34 = vsel %vm528_vm3, %v1030_v39, 0.0  ;;  %v533_v8 = vadd.f32 %v529_v32, %v521_v2 }
  0x6a   : > { %v787_v56 = vpop.eup %786  ;;  %v456_v38 = vadd.f32 %v1203_v43, %v455_v27  ;;  %v534_v9 = vadd.f32 %v530_v54, %v522_v4  ;;  %vm539_vm6 = vcmp.eq.s32.totalorder %v988_v19, 5  ;;  %vm540_vm7 = vcmp.eq.s32.totalorder %v990_v20, 5 }
  0x6b   : > { %v789_v21 = vpop.eup %788  ;;  %v462_v42 = vadd.f32 %v787_v56, %v461_v16  ;;  %790 = vlog2.f32 %v450_v33  ;;  %v541_v35 = vsel %vm537_vm4, %v1032_v40, 0.0  ;;  %v542_v36 = vsel %vm538_vm5, %v1037_v45, 0.0 }
  0x6c   : > { %v468_v28 = vadd.f32 %v789_v21, %v467_v13  ;;  %792 = vlog2.f32 %v456_v38  ;;  %v535_v11 = vadd.f32 %v531_v6, %v523_v44  ;;  %v536_v12 = vadd.f32 %v532_v34, %v524_v5 }
  0x6d   : > { %794 = vlog2.f32 %v462_v42  ;;  %v543_v3 = vsel %vm539_vm6, %v1039_v46, 0.0  ;;  %vm549_vm8 = vcmp.eq.s32.totalorder %v984_v17, 6  ;;  %vm550_vm9 = vcmp.eq.s32.totalorder %v986_v18, 6 }
  0x6e   : > { %796 = vlog2.f32 %v468_v28  ;;  %v544_v39 = vsel %vm540_vm7, %v1041_v47, 0.0  ;;  %v545_v63 = vadd.f32 %v541_v35, %v533_v8  ;;  %v546_v14 = vadd.f32 %v542_v36, %v534_v9 }
  0x6f   : > { %vm551_vm10 = vcmp.eq.s32.totalorder %v988_v19, 6  ;;  %vm552_vm11 = vcmp.eq.s32.totalorder %v990_v20, 6  ;;  %v561_v40 = vadd.f32 %v1136_v26, %v1111_v22  ;;  %v562_v45 = vadd.f32 %v1141_v37, %v1119_v61 }
  0x70   : > { %v553_v27 = vsel %vm549_vm8, %v1044_v49, 0.0  ;;  %v554_v15 = vsel %vm550_vm9, %v1046_v50, 0.0  ;;  %v563_v47 = vadd.f32 %v1146_v41, %v1125_v7  ;;  %v564_v1 = vadd.f32 %v1151_v51, %v1131_v25 }
  0x71   : > { %v791_v0 = vpop.eup %790  ;;  %v565_v2 = vadd.f32 %v1156_v60, %v561_v40  ;;  %v566_v13 = vadd.f32 %v1161_v62, %v562_v45  ;;  %vm573_vm12 = vcmp.lt.s32.totalorder %v984_v17, 2  ;;  %vm574_vm13 = vcmp.lt.s32.totalorder %v986_v18, 2 }
  0x72   : > { %v793_v46 = vpop.eup %792  ;;  %v470_v16 = vmul.f32 0.6931472, %v791_v0  ;;  %v567_v61 = vadd.f32 %v1166_v59, %v563_v47  ;;  %v568_v49 = vadd.f32 %v1171_v29, %v564_v1  ;;  %vm575_vm14 = vcmp.lt.s32.totalorder %v988_v19, 2 }
  0x73   : > { %v472_v22 = vmul.f32 0.6931472, %v793_v46  ;;  %v795_v50 = vpop.eup %794  ;;  %v569_v7 = vadd.f32 %v1177_v23, %v565_v2  ;;  %v570_v26 = vadd.f32 %v1182_v24, %v566_v13  ;;  %vm576_vm15 = vcmp.lt.s32.totalorder %v990_v20, 2 }
  0x74   : > { %v797_v25 = vpop.eup %796  ;;  %v571_v37 = vadd.f32 %v1188_v10, %v567_v61  ;;  %v572_v41 = vadd.f32 %v1194_v30, %v568_v49  ;;  %vm577_vm0 = vcmp.le.s32.totalorder %v984_v17, 5  ;;  %vm578_vm1 = vcmp.le.s32.totalorder %v986_v18, 5 }
  0x75   : > { %vm579_vm2 = vcmp.le.s32.totalorder %v988_v19, 5  ;;  %vm580_vm3 = vcmp.le.s32.totalorder %v990_v20, 5  ;;  %v581_v51 = vsel %vm577_vm0, %v569_v7, %v1198_v31  ;;  %v582_v60 = vsel %vm578_vm1, %v570_v26, %v1203_v43 }
  0x76   : > { %v583_v62 = vsel %vm579_vm2, %v571_v37, %v787_v56  ;;  %v584_v59 = vsel %vm580_vm3, %v572_v41, %v789_v21  ;;  %v585_v29 = vsel %vm573_vm12, %v1097_v48, %v581_v51  ;;  %v586_v23 = vsel %vm574_vm13, %v1101_v55, %v582_v60 }
  0x77   : > { %v587_v24 = vsel %vm575_vm14, %v1105_v57, %v583_v62  ;;  %v588_v10 = vsel %vm576_vm15, %v1113_v58, %v584_v59  ;;  %v589_v30 = vmax.f32 %v585_v29, 1e-37  ;;  %v590_v4 = vmax.f32 %v586_v23, 1e-37 }
  0x78   : > { %v474_v32 = vmul.f32 0.6931472, %v795_v50  ;;  %v547_v31 = vadd.f32 %v543_v3, %v535_v11  ;;  %v591_v33 = vmax.f32 %v587_v24, 1e-37  ;;  %v592_v43 = vmax.f32 %v588_v10, 1e-37 }
  0x79   : > { %v476_v44 = vmul.f32 0.6931472, %v797_v25  ;;  %v548_v5 = vadd.f32 %v544_v39, %v536_v12  ;;  %v555_v48 = vsel %vm551_vm10, %v1049_v52, 0.0  ;;  %798 = vlog2.f32 %v589_v30 }
  0x7a   : > { %v556_v55 = vsel %vm552_vm11, %v1051_v53, 0.0  ;;  %v557_v57 = vadd.f32 %v553_v27, %v545_v63  ;;  %v593_v54 = vmul.f32 2.0, %v470_v16  ;;  %800 = vlog2.f32 %v590_v4 }
  0x7b   : > { %v558_v58 = vadd.f32 %v554_v15, %v546_v14  ;;  %v594_v56 = vmul.f32 2.0, %v472_v22  ;;  %802 = vlog2.f32 %v591_v33  ;;  %v559_v38 = vadd.f32 %v555_v48, %v547_v31 }
  0x7c   : > { %v595_v6 = vmul.f32 2.0, %v474_v32  ;;  %804 = vlog2.f32 %v592_v43  ;;  %v560_v21 = vadd.f32 %v556_v55, %v548_v5  ;;  %v596_v42 = vmul.f32 2.0, %v476_v44 }
  0x7d   : > { %v597_v34 = vsub.f32 %v593_v54, %v557_v57  ;;  %v598_v28 = vsub.f32 %v594_v56, %v558_v58  ;;  %vm613_vm4 = vcmp.ge.s32.totalorder %v984_v17, 0  ;;  %vm614_vm5 = vcmp.ge.s32.totalorder %v986_v18, 0 }
  0x7e   : > { %v599_v9 = vsub.f32 %v595_v6, %v559_v38  ;;  %v600_v11 = vsub.f32 %v596_v42, %v560_v21  ;;  %vm615_vm6 = vcmp.ge.s32.totalorder %v988_v19, 0  ;;  %vm616_vm7 = vcmp.ge.s32.totalorder %v990_v20, 0 }
  0x7f   : > { %v799_v8 = vpop.eup %798 }
  0x80   : > { %v801_v52 = vpop.eup %800  ;;  %v602_v35 = vmul.f32 0.6931472, %v799_v8 }
  0x81   : > { %v803_v36 = vpop.eup %802  ;;  %v604_v53 = vmul.f32 0.6931472, %v801_v52 }
  0x82   : > { %v805_v12 = vpop.eup %804  ;;  %v606_v3 = vmul.f32 0.6931472, %v803_v36  ;;  %v609_v39 = vsub.f32 %v597_v34, %v602_v35 }
  0x83   : > { %v608_v63 = vmul.f32 0.6931472, %v805_v12  ;;  %v610_v14 = vsub.f32 %v598_v28, %v604_v53 }
  0x84   : > { %v611_v0 = vsub.f32 %v599_v9, %v606_v3  ;;  %v617_v40 = vsel %vm613_vm4, %v609_v39, 0.0 }
  0x85   : > { %v612_v45 = vsub.f32 %v600_v11, %v608_v63  ;;  %v618_v46 = vsel %vm614_vm5, %v610_v14, 0.0 }
  0x86   : > { %v619_v27 = vsel %vm615_vm6, %v611_v0, 0.0  ;;  %v621_v15 = vadd.f32 %v618_v46, %v617_v40 }
  0x87   : > { %v620_v47 = vsel %vm616_vm7, %v612_v45, 0.0 }
  0x88   : > { %v622_v17 = vadd.f32 %v621_v15, %v619_v27 }
  0x8a   : > { %v623_v18 = vadd.f32 %v622_v17, %v620_v47 }
  0x8c   : > { %624 = vst [vmem:[%s303_s5] sm:$0xff] %v623_v18 }
  0x8d PF: > { %p9_p9 = scmp.ge.s32.totalorder %s862_s13, 5   ;;  %s1286_s9 = smov %s824_s10 }
  0x8e   : > { %s1287_s10 = smov %s871_s16  ;;  %s1288_s11 = smov %s862_s13 }
  0x8f   :  { %11 = sbr.rel (!%p9_p9) target bundleno = 2 (0x2), region = 104 }

</bundles_post_ra>
